<compile_context>
chip_gen: v6e
topology: v6e:2x2x1
jax: 0.10.0
libtpu: 0.0.40
codegen_flags: <defaults>
</compile_context>

<pallas_src>
import jax
import jax.numpy as jnp
from jax.experimental import pallas as pl
from jax.experimental.pallas import tpu as pltpu


# ----------------------------------------------------------------------------
# Per-generation budgets
# ----------------------------------------------------------------------------
def _chip_config():
    kind = ""
    try:
        kind = jax.devices()[0].device_kind.lower()
    except Exception:
        pass
    if "v7" in kind or "7x" in kind:
        # 2 TensorCores/chip, 64 MiB VMEM/TC, fast HBM -> big tiles, but keep
        # >=2 grid steps so both cores get work.
        return dict(target_tile_bytes=8 << 20, vmem_limit_bytes=48 << 20,
                    two_tensorcores=True)
    if "v6" in kind:
        return dict(target_tile_bytes=6 << 20, vmem_limit_bytes=64 << 20,
                    two_tensorcores=False)
    if "v5" in kind:
        # v5e scoped-VMEM default is only 16 MiB; physical is 128 MiB.
        return dict(target_tile_bytes=6 << 20, vmem_limit_bytes=96 << 20,
                    two_tensorcores=False)
    # Unknown chip: stay inside any default scoped limit, no override.
    return dict(target_tile_bytes=3 << 20, vmem_limit_bytes=None,
                two_tensorcores=False)


# ----------------------------------------------------------------------------
# Kernels
# ----------------------------------------------------------------------------
def _mlp(v, w1, b1, w2, b2):
    h = jnp.maximum(jnp.dot(v, w1, preferred_element_type=jnp.float32) + b1, 0.0)
    return jax.nn.sigmoid(jnp.dot(h, w2, preferred_element_type=jnp.float32) + b2)


def se_fused_kernel(x_ref, w1_ref, b1_ref, w2_ref, b2_ref, o_ref):
    # x_ref: (TB, C, HW); weights packed along axis 0: 0 = avg branch, 1 = max.
    hw = x_ref.shape[-1]
    x = x_ref[...]

    # Spatial pooling. dtype=f32 keeps the accumulation in f32 without
    # materializing a full-tile f32 copy for bf16 inputs.
    # TODO(synk): if VPU/vld slots saturate on v7x, offload the sum to the MXU
    # via (TB*C, HW) @ ones((HW, 1)); neutral on v5e/v6e where DMA hides it.
    x_avg = jnp.sum(x, axis=-1, dtype=jnp.float32) * (1.0 / hw)      # (TB, C)
    x_max = jnp.max(x, axis=-1).astype(jnp.float32)                  # (TB, C)

    gate = (_mlp(x_avg, w1_ref[0], b1_ref[0], w2_ref[0], b2_ref[0]) +
            _mlp(x_max, w1_ref[1], b1_ref[1], w2_ref[1], b2_ref[1]))

    # Gating multiply in the output dtype (bf16 inputs stay bf16, matching a
    # bf16 PyTorch forward; f32 inputs are bit-identical to an f32 gate).
    o_ref[...] = gate.astype(o_ref.dtype)[:, :, None] * x


def se_pool_kernel(x_ref, avg_ref, max_ref):
    # x_ref: (1, C_chunk, HW) -> per-channel mean/max, shape (1, C_chunk, 1).
    hw = x_ref.shape[-1]
    x = x_ref[...]
    avg_ref[...] = jnp.sum(x, axis=-1, keepdims=True, dtype=jnp.float32) * (1.0 / hw)
    max_ref[...] = jnp.max(x, axis=-1, keepdims=True).astype(jnp.float32)


def se_scale_kernel(gate_ref, x_ref, o_ref):
    # gate_ref: (1, C_chunk, 1); x_ref/o_ref: (1, C_chunk, HW).
    o_ref[...] = gate_ref[...].astype(o_ref.dtype) * x_ref[...]


# ----------------------------------------------------------------------------
# Tiling helpers
# ----------------------------------------------------------------------------
def _pick_batch_tile(B, bytes_per_batch, target_tile_bytes, two_tensorcores):
    """Largest divisor TB of B whose tile fits the budget.  On 2-TC chips keep
    >=2 grid steps so both cores get work; on single-TC parts allow TB == B."""
    max_tb = max(1, B // 2) if two_tensorcores else B
    tb = 1
    for cand in range(1, max_tb + 1):
        if B % cand == 0 and cand * bytes_per_batch <= target_tile_bytes:
            tb = cand
    return tb


def _pick_channel_chunk(C, bytes_per_channel, target_tile_bytes):
    """Largest multiple-of-8 divisor of C whose (1, CC, HW) block fits."""
    if C * bytes_per_channel <= target_tile_bytes:
        return C
    best = None
    for cand in range(8, C + 1, 8):
        if C % cand == 0 and cand * bytes_per_channel <= target_tile_bytes:
            best = cand
    if best is None:
        # No fitting multiple-of-8 divisor; take the smallest legal chunk and
        # rely on the raised vmem limit.
        best = 8 if C % 8 == 0 else C
    return best


# ----------------------------------------------------------------------------
# Wrapper
# ----------------------------------------------------------------------------
def se_layer(x, params, *, target_tile_bytes=None, vmem_limit_bytes=None):
    """x: (B, C, H, W).  params: dict of MLP weights/biases (see init_params)."""
    B, C, H, W = x.shape
    HW = H * W

    cfg = _chip_config()
    if target_tile_bytes is None:
        target_tile_bytes = cfg["target_tile_bytes"]
    if vmem_limit_bytes is None:
        vmem_limit_bytes = cfg["vmem_limit_bytes"]

    Cr = params["w1a"].shape[1]
    assert Cr >= 1, "channel // reduction must be >= 1 (channel < reduction?)"

    x_flat = x.reshape(B, C, HW)
    itemsize = x.dtype.itemsize
    bytes_per_batch = C * HW * itemsize

    # TODO(synk): if HW is far from a multiple of 128 and C is lane-friendly, a
    # channels-last (B, HW, C) view avoids masked partial stores; not worth the
    # extra transpose pass for this mem-bound kernel at these shapes (HW=256).

    if bytes_per_batch <= target_tile_bytes:
        # -------- fused single-pass path --------
        TB = _pick_batch_tile(B, bytes_per_batch, target_tile_bytes,
                              cfg["two_tensorcores"])

        # Pack 8 tiny weight/bias operands into 4 (axis 0: 0 = avg, 1 = max).
        w1 = jnp.stack([params["w1a"], params["w1m"]])      # (2, C, Cr)
        b1 = jnp.stack([params["b1a"], params["b1m"]])      # (2, 1, Cr)
        w2 = jnp.stack([params["w2a"], params["w2m"]])      # (2, Cr, C)
        b2 = jnp.stack([params["b2a"], params["b2m"]])      # (2, 1, C)

        full = lambda shape: pl.BlockSpec(shape, lambda i: (0,) * len(shape))

        out = pl.pallas_call(
            se_fused_kernel,
            out_shape=jax.ShapeDtypeStruct((B, C, HW), x.dtype),
            grid_spec=pltpu.PrefetchScalarGridSpec(
                num_scalar_prefetch=0,
                grid=(B // TB,),
                in_specs=[
                    pl.BlockSpec((TB, C, HW), lambda i: (i, 0, 0)),   # x tile
                    full((2, C, Cr)), full((2, 1, Cr)),               # L1 w, b
                    full((2, Cr, C)), full((2, 1, C)),                # L2 w, b
                ],
                out_specs=pl.BlockSpec((TB, C, HW), lambda i: (i, 0, 0)),
            ),
            compiler_params=pltpu.CompilerParams(
                dimension_semantics=("parallel",),
                vmem_limit_bytes=vmem_limit_bytes),
        )(x_flat, w1, b1, w2, b2)
        return out.reshape(B, C, H, W)

    # -------- fallback: one batch element exceeds the budget; chunk channels --
    bytes_per_channel = HW * itemsize
    CC = _pick_channel_chunk(C, bytes_per_channel, target_tile_bytes)
    grid2 = (B, C // CC)
    cparams2 = pltpu.CompilerParams(
        dimension_semantics=("parallel", "parallel"),
        vmem_limit_bytes=vmem_limit_bytes)

    pooled_avg, pooled_max = pl.pallas_call(
        se_pool_kernel,
        out_shape=(jax.ShapeDtypeStruct((B, C, 1), jnp.float32),
                   jax.ShapeDtypeStruct((B, C, 1), jnp.float32)),
        grid_spec=pltpu.PrefetchScalarGridSpec(
            num_scalar_prefetch=0,
            grid=grid2,
            in_specs=[pl.BlockSpec((1, CC, HW), lambda b, c: (b, c, 0))],
            out_specs=(pl.BlockSpec((1, CC, 1), lambda b, c: (b, c, 0)),
                       pl.BlockSpec((1, CC, 1), lambda b, c: (b, c, 0))),
        ),
        compiler_params=cparams2,
    )(x_flat)

    # Tiny (B, C) gate MLPs in plain JAX (negligible next to two passes over x).
    gate = (_mlp(pooled_avg[..., 0], params["w1a"], params["b1a"],
                 params["w2a"], params["b2a"]) +
            _mlp(pooled_max[..., 0], params["w1m"], params["b1m"],
                 params["w2m"], params["b2m"]))
    gate = gate[..., None].astype(x.dtype)                  # (B, C, 1)

    out = pl.pallas_call(
        se_scale_kernel,
        out_shape=jax.ShapeDtypeStruct((B, C, HW), x.dtype),
        grid_spec=pltpu.PrefetchScalarGridSpec(
            num_scalar_prefetch=0,
            grid=grid2,
            in_specs=[pl.BlockSpec((1, CC, 1), lambda b, c: (b, c, 0)),
                      pl.BlockSpec((1, CC, HW), lambda b, c: (b, c, 0))],
            out_specs=pl.BlockSpec((1, CC, HW), lambda b, c: (b, c, 0)),
        ),
        compiler_params=cparams2,
    )(gate, x_flat)
    return out.reshape(B, C, H, W)


# ----------------------------------------------------------------------------
# Params & reference
# ----------------------------------------------------------------------------
def init_params(key, channel, reduction):
    """Deterministic init matching nn.Linear shapes (weights stored as (in, out))."""
    cr = channel // reduction
    assert cr >= 1, "channel // reduction must be >= 1"
    ks = jax.random.split(key, 8)

    def lin(kw, kb, fan_in, fan_out):
        bound = 1.0 / jnp.sqrt(fan_in)
        w = jax.random.uniform(kw, (fan_in, fan_out), jnp.float32, -bound, bound)
        b = jax.random.uniform(kb, (1, fan_out), jnp.float32, -bound, bound)
        return w, b

    w1a, b1a = lin(ks[0], ks[1], channel, cr)
    w2a, b2a = lin(ks[2], ks[3], cr, channel)
    w1m, b1m = lin(ks[4], ks[5], channel, cr)
    w2m, b2m = lin(ks[6], ks[7], cr, channel)
    return dict(w1a=w1a, b1a=b1a, w2a=w2a, b2a=b2a,
                w1m=w1m, b1m=b1m, w2m=w2m, b2m=b2m)


def se_layer_ref(x, p):
    """Pure-JAX reference reproducing the PyTorch forward exactly."""
    xa = jnp.mean(x, axis=(2, 3))                       # AdaptiveAvgPool2d(1)
    xm = jnp.max(x, axis=(2, 3))                        # AdaptiveMaxPool2d(1)
    ga = _mlp(xa, p["w1a"], p["b1a"], p["w2a"], p["b2a"])
    gm = _mlp(xm, p["w1m"], p["b1m"], p["w2m"], p["b2m"])
    return (ga + gm)[:, :, None, None] * x


if __name__ == "__main__":
    reduction = 16  # module default; hidden = C // 16
    key = jax.random.PRNGKey(0)
    kx, kp, kx2 = jax.random.split(key, 3)

    # Case 1: small module-consistent shape (fused path).
    B, C, H, W = 2, 32, 16, 16
    x = jax.random.normal(kx, (B, C, H, W), jnp.float32)
    params = init_params(kp, C, reduction)

    y = jax.block_until_ready(se_layer(x, params))
    y_ref = se_layer_ref(x, params)
    assert y.shape == (B, C, H, W)
    assert jnp.allclose(y, y_ref, atol=1e-5, rtol=1e-5), "mismatch vs reference (B=2)"

    # Case 2: larger batch exercises batch folding in the fused path.
    B2 = 8
    x2 = jax.random.normal(kx2, (B2, C, H, W), jnp.float32)
    y2 = jax.block_until_ready(se_layer(x2, params))
    y2_ref = se_layer_ref(x2, params)
    assert jnp.allclose(y2, y2_ref, atol=1e-5, rtol=1e-5), "mismatch vs reference (B=8)"

    # Case 3: force the channel-chunked two-pass fallback (tiny tile budget).
    y3 = jax.block_until_ready(se_layer(x2, params, target_tile_bytes=16 * 1024))
    assert jnp.allclose(y3, y2_ref, atol=1e-5, rtol=1e-5), "mismatch vs reference (fallback)"

    print("KERNEL_OK")
</pallas_src>

<mosaic_0001>
module attributes {stable_mosaic.version = 11 : i64} {
  func.func @se_fused_kernel(%arg0: i32, %arg1: memref<2x32x256xf32, #tpu.memory_space<vmem>>, %arg2: memref<2x32x2xf32, #tpu.memory_space<vmem>>, %arg3: memref<2x1x2xf32, #tpu.memory_space<vmem>>, %arg4: memref<2x2x32xf32, #tpu.memory_space<vmem>>, %arg5: memref<2x1x32xf32, #tpu.memory_space<vmem>>, %arg6: memref<2x32x256xf32, #tpu.memory_space<vmem>>) attributes {dimension_semantics = [#tpu.dimension_semantics<parallel>], iteration_bounds = array<i64: 1>, scalar_prefetch = 0 : i64, scratch_operands = 0 : i64, tpu.core_type = #tpu.core_type<tc>, window_params = [{transform_indices = @transform_0, window_bounds = array<i64: 2, 32, 256>}, {pipeline_mode = #tpu.pipeline_mode<synchronous>, transform_indices = @transform_1, window_bounds = array<i64: 2, 32, 2>}, {pipeline_mode = #tpu.pipeline_mode<synchronous>, transform_indices = @transform_2, window_bounds = array<i64: 2, 1, 2>}, {pipeline_mode = #tpu.pipeline_mode<synchronous>, transform_indices = @transform_3, window_bounds = array<i64: 2, 2, 32>}, {pipeline_mode = #tpu.pipeline_mode<synchronous>, transform_indices = @transform_4, window_bounds = array<i64: 2, 1, 32>}, {transform_indices = @transform_5, window_bounds = array<i64: 2, 32, 256>}]} {
    %c0 = arith.constant 0 : index
    %c0_0 = arith.constant 0 : index
    %c0_1 = arith.constant 0 : index
    %0 = vector.load %arg1[%c0, %c0_0, %c0_1] : memref<2x32x256xf32, #tpu.memory_space<vmem>>, vector<2x32x256xf32>
    %cst = arith.constant dense<0.000000e+00> : vector<2x32xf32>
    %1 = vector.multi_reduction <add>, %0, %cst [2] : vector<2x32x256xf32> to vector<2x32xf32>
    %cst_2 = arith.constant 3.906250e-03 : f32
    %2 = vector.broadcast %cst_2 : f32 to vector<2x32xf32>
    %3 = arith.mulf %1, %2 : vector<2x32xf32>
    %cst_3 = arith.constant dense<0xFF800000> : vector<2x32xf32>
    %4 = vector.multi_reduction <maximumf>, %0, %cst_3 [2] : vector<2x32x256xf32> to vector<2x32xf32>
    %c0_4 = arith.constant 0 : index
    %c0_5 = arith.constant 0 : index
    %c0_6 = arith.constant 0 : index
    %5 = vector.load %arg2[%c0_4, %c0_5, %c0_6] : memref<2x32x2xf32, #tpu.memory_space<vmem>>, vector<1x32x2xf32>
    %6 = vector.shape_cast %5 : vector<1x32x2xf32> to vector<32x2xf32>
    %c0_7 = arith.constant 0 : index
    %c0_8 = arith.constant 0 : index
    %c0_9 = arith.constant 0 : index
    %7 = vector.load %arg3[%c0_7, %c0_8, %c0_9] : memref<2x1x2xf32, #tpu.memory_space<vmem>>, vector<1x1x2xf32>
    %8 = vector.shape_cast %7 : vector<1x1x2xf32> to vector<1x2xf32>
    %c0_10 = arith.constant 0 : index
    %c0_11 = arith.constant 0 : index
    %c0_12 = arith.constant 0 : index
    %9 = vector.load %arg4[%c0_10, %c0_11, %c0_12] : memref<2x2x32xf32, #tpu.memory_space<vmem>>, vector<1x2x32xf32>
    %10 = vector.shape_cast %9 : vector<1x2x32xf32> to vector<2x32xf32>
    %c0_13 = arith.constant 0 : index
    %c0_14 = arith.constant 0 : index
    %c0_15 = arith.constant 0 : index
    %11 = vector.load %arg5[%c0_13, %c0_14, %c0_15] : memref<2x1x32xf32, #tpu.memory_space<vmem>>, vector<1x1x32xf32>
    %12 = vector.shape_cast %11 : vector<1x1x32xf32> to vector<1x32xf32>
    %cst_16 = arith.constant dense<0.000000e+00> : vector<2x2xf32>
    %13 = tpu.matmul %3, %6, %cst_16 {dimension_numbers = #tpu.dot_dimension_numbers<[1], [0], [0], [1], [0, 0, 1, 1], [], []>} : vector<2x32xf32>, vector<32x2xf32>, vector<2x2xf32> -> vector<2x2xf32>
    %14 = vector.broadcast %8 : vector<1x2xf32> to vector<2x2xf32>
    %15 = arith.addf %13, %14 : vector<2x2xf32>
    %cst_17 = arith.constant 0.000000e+00 : f32
    %16 = vector.broadcast %cst_17 : f32 to vector<2x2xf32>
    %17 = arith.maximumf %15, %16 : vector<2x2xf32>
    %cst_18 = arith.constant dense<0.000000e+00> : vector<2x32xf32>
    %18 = tpu.matmul %17, %10, %cst_18 {dimension_numbers = #tpu.dot_dimension_numbers<[1], [0], [0], [1], [0, 0, 1, 1], [], []>} : vector<2x2xf32>, vector<2x32xf32>, vector<2x32xf32> -> vector<2x32xf32>
    %19 = vector.broadcast %12 : vector<1x32xf32> to vector<2x32xf32>
    %20 = arith.addf %18, %19 : vector<2x32xf32>
    %21 = arith.negf %20 : vector<2x32xf32>
    %22 = math.exp %21 : vector<2x32xf32>
    %cst_19 = arith.constant 1.000000e+00 : f32
    %23 = vector.broadcast %cst_19 : f32 to vector<2x32xf32>
    %24 = arith.addf %23, %22 : vector<2x32xf32>
    %25 = arith.divf %23, %24 : vector<2x32xf32>
    %c1 = arith.constant 1 : index
    %c0_20 = arith.constant 0 : index
    %c0_21 = arith.constant 0 : index
    %26 = vector.load %arg2[%c1, %c0_20, %c0_21] : memref<2x32x2xf32, #tpu.memory_space<vmem>>, vector<1x32x2xf32>
    %27 = vector.shape_cast %26 : vector<1x32x2xf32> to vector<32x2xf32>
    %c1_22 = arith.constant 1 : index
    %c0_23 = arith.constant 0 : index
    %c0_24 = arith.constant 0 : index
    %28 = vector.load %arg3[%c1_22, %c0_23, %c0_24] : memref<2x1x2xf32, #tpu.memory_space<vmem>>, vector<1x1x2xf32>
    %29 = vector.shape_cast %28 : vector<1x1x2xf32> to vector<1x2xf32>
    %c1_25 = arith.constant 1 : index
    %c0_26 = arith.constant 0 : index
    %c0_27 = arith.constant 0 : index
    %30 = vector.load %arg4[%c1_25, %c0_26, %c0_27] : memref<2x2x32xf32, #tpu.memory_space<vmem>>, vector<1x2x32xf32>
    %31 = vector.shape_cast %30 : vector<1x2x32xf32> to vector<2x32xf32>
    %c1_28 = arith.constant 1 : index
    %c0_29 = arith.constant 0 : index
    %c0_30 = arith.constant 0 : index
    %32 = vector.load %arg5[%c1_28, %c0_29, %c0_30] : memref<2x1x32xf32, #tpu.memory_space<vmem>>, vector<1x1x32xf32>
    %33 = vector.shape_cast %32 : vector<1x1x32xf32> to vector<1x32xf32>
    %cst_31 = arith.constant dense<0.000000e+00> : vector<2x2xf32>
    %34 = tpu.matmul %4, %27, %cst_31 {dimension_numbers = #tpu.dot_dimension_numbers<[1], [0], [0], [1], [0, 0, 1, 1], [], []>} : vector<2x32xf32>, vector<32x2xf32>, vector<2x2xf32> -> vector<2x2xf32>
    %35 = vector.broadcast %29 : vector<1x2xf32> to vector<2x2xf32>
    %36 = arith.addf %34, %35 : vector<2x2xf32>
    %cst_32 = arith.constant 0.000000e+00 : f32
    %37 = vector.broadcast %cst_32 : f32 to vector<2x2xf32>
    %38 = arith.maximumf %36, %37 : vector<2x2xf32>
    %cst_33 = arith.constant dense<0.000000e+00> : vector<2x32xf32>
    %39 = tpu.matmul %38, %31, %cst_33 {dimension_numbers = #tpu.dot_dimension_numbers<[1], [0], [0], [1], [0, 0, 1, 1], [], []>} : vector<2x2xf32>, vector<2x32xf32>, vector<2x32xf32> -> vector<2x32xf32>
    %40 = vector.broadcast %33 : vector<1x32xf32> to vector<2x32xf32>
    %41 = arith.addf %39, %40 : vector<2x32xf32>
    %42 = arith.negf %41 : vector<2x32xf32>
    %43 = math.exp %42 : vector<2x32xf32>
    %cst_34 = arith.constant 1.000000e+00 : f32
    %44 = vector.broadcast %cst_34 : f32 to vector<2x32xf32>
    %45 = arith.addf %44, %43 : vector<2x32xf32>
    %46 = arith.divf %44, %45 : vector<2x32xf32>
    %47 = arith.addf %25, %46 : vector<2x32xf32>
    %48 = vector.shape_cast %47 : vector<2x32xf32> to vector<2x32x1xf32>
    %49 = vector.broadcast %48 : vector<2x32x1xf32> to vector<2x32x256xf32>
    %50 = arith.mulf %49, %0 : vector<2x32x256xf32>
    %c0_35 = arith.constant 0 : index
    %c0_36 = arith.constant 0 : index
    %c0_37 = arith.constant 0 : index
    %51 = vector.load %arg6[%c0_35, %c0_36, %c0_37] : memref<2x32x256xf32, #tpu.memory_space<vmem>>, vector<2x32x256xf32>
    tpu.vector_store %arg6[%c0_35, %c0_36, %c0_37], %50 {strides = array<i32>} : memref<2x32x256xf32, #tpu.memory_space<vmem>>, vector<2x32x256xf32>,
    return
  }
  func.func @transform_0(%arg0: i32) -> (i32, i32, i32) {
    %c0_i32 = arith.constant 0 : i32
    %c0_i32_0 = arith.constant 0 : i32
    %c0_i32_1 = arith.constant 0 : i32
    return %arg0, %c0_i32, %c0_i32_0 : i32, i32, i32
  }
  func.func @transform_1(%arg0: i32) -> (i32, i32, i32) {
    %c0_i32 = arith.constant 0 : i32
    %c0_i32_0 = arith.constant 0 : i32
    %c0_i32_1 = arith.constant 0 : i32
    %c0_i32_2 = arith.constant 0 : i32
    return %c0_i32, %c0_i32_0, %c0_i32_1 : i32, i32, i32
  }
  func.func @transform_2(%arg0: i32) -> (i32, i32, i32) {
    %c0_i32 = arith.constant 0 : i32
    %c0_i32_0 = arith.constant 0 : i32
    %c0_i32_1 = arith.constant 0 : i32
    %c0_i32_2 = arith.constant 0 : i32
    return %c0_i32, %c0_i32_0, %c0_i32_1 : i32, i32, i32
  }
  func.func @transform_3(%arg0: i32) -> (i32, i32, i32) {
    %c0_i32 = arith.constant 0 : i32
    %c0_i32_0 = arith.constant 0 : i32
    %c0_i32_1 = arith.constant 0 : i32
    %c0_i32_2 = arith.constant 0 : i32
    return %c0_i32, %c0_i32_0, %c0_i32_1 : i32, i32, i32
  }
  func.func @transform_4(%arg0: i32) -> (i32, i32, i32) {
    %c0_i32 = arith.constant 0 : i32
    %c0_i32_0 = arith.constant 0 : i32
    %c0_i32_1 = arith.constant 0 : i32
    %c0_i32_2 = arith.constant 0 : i32
    return %c0_i32, %c0_i32_0, %c0_i32_1 : i32, i32, i32
  }
  func.func @transform_5(%arg0: i32) -> (i32, i32, i32) {
    %c0_i32 = arith.constant 0 : i32
    %c0_i32_0 = arith.constant 0 : i32
    %c0_i32_1 = arith.constant 0 : i32
    return %arg0, %c0_i32, %c0_i32_0 : i32, i32, i32
  }
}

</mosaic_0001>

<bundles_post_ra>
// kernel: tpu_custom_call.1
= control target key start
LH: loop header
LB: loop body
LE: loop exit
PB: predicated region body
PF: predicated region fallthrough
CT: control target
= control target key end

     0   :  { %10 = vsyncpa [#allocation3], 0  ;;  %s992_s0 = inlined_call_operand.hbm [shape: f32[2,32,256], index: 0, kind: input, shape index: {}]   ;;  %s993_s1 = inlined_call_operand.vmem [shape: f32[2,32,2], index: 1, kind: input, shape index: {}]   ;;  %s994_s2 = inlined_call_operand.vmem [shape: f32[2,1,2], index: 2, kind: input, shape index: {}]   ;;  %s995_s3 = inlined_call_operand.vmem [shape: f32[2,2,32], index: 3, kind: input, shape index: {}]   ;;  %s996_s4 = inlined_call_operand.vmem [shape: f32[2,1,32], index: 4, kind: input, shape index: {}]   ;;  %s997_s5 = inlined_call_operand.hbm [shape: f32[2,32,256], index: 5, kind: output, shape index: {}]  }
   0x1   :  { %11 = vsyncpa [#allocation4], 0  ;;  %s776_s18 = smov [#allocation2]  }
   0x2   :  { %s17_s19 = sshll.u32 %s776_s18, 4  ;;  %s18_s19 = int_to_ptr.vmem [resolvable:$true] %s17_s19 }
   0x3   :  { %s740_s20 = scalar_lea.vmem %s18_s19, 2048  ;;  %p745_p1 = scmp.lt.s32.totalorder %s18_s19, %s18_s19 }
   0x4   :  { %p741_p0 = scmp.ne.s32.totalorder %s18_s19, %s740_s20  ;;  %p746_p2 = scmp.lt.s32.totalorder %s740_s20, %s740_s20 }
   0x6   :  { %p747_p3 = por %p746_p2, %p745_p1 }
   0x8   :  { %p748_p4 = pnand %p747_p3, %p741_p0 }
   0xa   :  { %751 = shalt.err (!%p748_p4)
}
   0xb   :  { %s777_s21 = smov 256   ;;  %s778_s22 = smov 16  }
   0xc   :  { %23 = dma.hbm_to_vmem [thread:$0]  %s992_s0, 2048, %s18_s19, [#allocation3], %s777_s21, %s777_s21, %s778_s22  }
   0xd   :  { %772 = dma.done.wait [#allocation3], 2048  }
   0xe   :  { %773 = vsyncadd [#allocation3], 4294965248  ;;  %v818_v0 = vld [vmem:[#allocation2 + $0x40] sm:$0xff]  ;;  %v820_v1 = vld [vmem:[#allocation2 + $0x48] sm:$0xff]  ;;  %v779_v24 = vmov 0.0   ;;  %vm780_vm0 = vmmov 0   ;;  %v128_v37 = vlaneseq }
   0xf   :  { %v822_v2 = vld [vmem:[#allocation2] sm:$0xff]  ;;  %v63_v3 = vadd.f32 %v820_v1, %v818_v0  ;;  %v826_v4 = vld [vmem:[#allocation2 + $0x8] sm:$0xff]  ;;  %v828_v5 = vld [vmem:[#allocation2 + $0x50] sm:$0xff]  ;;  %686 = vmatprep.subr.mxu0 %v779_v24  ;;  %697 = vmatprep.subr.mxu1 %v779_v24  ;;  %v95_v32 = vmax.f32 %v818_v0, %v820_v1  ;;  %vm139_vm1 = vcmask 130112   ;;  %vm146_vm2 = vcmask 195712  }
  0x10   :  { %v830_v6 = vld [vmem:[#allocation2 + $0x58] sm:$0xff]  ;;  %v51_v7 = vadd.f32 %v826_v4, %v822_v2  ;;  %v834_v8 = vld [vmem:[#allocation2 + $0x10] sm:$0xff]  ;;  %v842_v12 = vld [vmem:[#allocation2 + $0x60] sm:$0xff]  ;;  %694 = vmatprep.mubr.msk.f32.mxu0 %vm780_vm0, %v779_v24  ;;  %699 = vmatprep.mubr.msk.f32.mxu1 %vm780_vm0, %v779_v24  ;;  %v83_v30 = vmax.f32 %v822_v2, %v826_v4  ;;  %v129_v39 = vand.u32 127, %v128_v37  ;;  %v904_v44 = vshrl.u32 %v128_v37, 7 }
  0x11   :  { %v836_v9 = vld [vmem:[#allocation2 + $0x18] sm:$0xff]  ;;  %64 = vadd.xlane.f32.xlu1 %v63_v3  ;;  %v66_v10 = vadd.f32 %v830_v6, %v828_v5  ;;  %v844_v13 = vld [vmem:[#allocation2 + $0x68] sm:$0xff]  ;;  %v846_v14 = vld [vmem:[#allocation2 + $0x20] sm:$0xff]  ;;  %v98_v31 = vmax.f32 %v828_v5, %v830_v6  ;;  %vm153_vm3 = vcmask 261312   ;;  %vm174_vm4 = vcmask 1041409  }
  0x12   :  { %52 = vadd.xlane.f32.xlu0 %v51_v7  ;;  %v54_v11 = vadd.f32 %v836_v9, %v834_v8  ;;  %v848_v15 = vld [vmem:[#allocation2 + $0x28] sm:$0xff]  ;;  %v69_v16 = vadd.f32 %v844_v13, %v842_v12  ;;  %v854_v18 = vld [vmem:[#allocation2 + $0x70] sm:$0xff]  ;;  %v856_v19 = vld [vmem:[#allocation2 + $0x78] sm:$0xff]  ;;  %v86_v29 = vmax.f32 %v834_v8, %v836_v9  ;;  %v101_v33 = vmax.f32 %v842_v12, %v844_v13 }
  0x13   :  { %v57_v17 = vadd.f32 %v848_v15, %v846_v14  ;;  %v858_v20 = vld [vmem:[#allocation2 + $0x30] sm:$0xff]  ;;  %v860_v21 = vld [vmem:[#allocation2 + $0x38] sm:$0xff]  ;;  %v72_v22 = vadd.f32 %v856_v19, %v854_v18  ;;  %v108_v27 = vld [vmem:[%s993_s1 + $0x8] sm:$0xff]  ;;  %v89_v34 = vmax.f32 %v846_v14, %v848_v15  ;;  %v104_v35 = vmax.f32 %v854_v18, %v856_v19 }
  0x14   :  { %v60_v23 = vadd.f32 %v860_v21, %v858_v20  ;;  %v110_v25 = vld [vmem:[%s993_s1 + $0x18] sm:$0xff]  ;;  %v109_v26 = vld [vmem:[%s993_s1 + $0x10] sm:$0xff]  ;;  %v107_v28 = vld [vmem:[%s993_s1] sm:$0xff]  ;;  %v92_v36 = vmax.f32 %v858_v20, %v860_v21  ;;  %v134_v41 = vadd.s32 4294967288, %v129_v39  ;;  %v141_v43 = vadd.s32 4294967280, %v129_v39 }
  0x15   :  { %67 = vadd.xlane.f32.xlu1 %v66_v10  ;;  %687 = vmatpush3.msra.mxu0 %v110_v25  ;;  %v148_v48 = vadd.s32 4294967272, %v129_v39  ;;  %v132_v52 = vsub.s32 %v129_v39, %v904_v44  ;;  %vm176_vm5 = vcmask 261120   ;;  %vm260_vm6 = vcmask 1041408  }
  0x16   :  { %55 = vadd.xlane.f32.xlu0 %v54_v11  ;;  %688 = vmatprep.subr.mxu0 %v779_v24  ;;  %v137_v46 = vsub.s32 %v134_v41, %v904_v44  ;;  %v144_v50 = vsub.s32 %v141_v43, %v904_v44  ;;  %vm256_vm7 = vcmask 15360  }
  0x17   :  { %689 = vmatpush3.msra.mxu0 %v109_v26  ;;  %v151_v59 = vsub.s32 %v148_v48, %v904_v44 }
  0x18   :  { %690 = vmatprep.subr.mxu0 %v779_v24 }
  0x19   :  { %70 = vadd.xlane.f32.xlu1 %v69_v16  ;;  %691 = vmatpush3.msra.mxu0 %v108_v27 }
  0x1a   :  { %58 = vadd.xlane.f32.xlu0 %v57_v17  ;;  %692 = vmatprep.subr.mxu0 %v779_v24 }
  0x1b   :  { %693 = vmatpush3.msra.mxu0 %v107_v28 }
  0x1c   :  { %713 = vmatprep.subr.mxu0 %v779_v24 }
  0x1d   :  { %73 = vadd.xlane.f32.xlu1 %v72_v22 }
  0x1e   :  { %61 = vadd.xlane.f32.xlu0 %v60_v23 }
  0x21   :  { %87 = vmax.xlane.f32.xlu1 %v86_v29 }
  0x22   :  { %84 = vmax.xlane.f32.xlu0 %v83_v30 }
  0x25   :  { %99 = vmax.xlane.f32.xlu1 %v98_v31 }
  0x26   :  { %96 = vmax.xlane.f32.xlu0 %v95_v32 }
  0x29   :  { %102 = vmax.xlane.f32.xlu1 %v101_v33 }
  0x2a   :  { %90 = vmax.xlane.f32.xlu0 %v89_v34 }
  0x2d   :  { %105 = vmax.xlane.f32.xlu1 %v104_v35 }
  0x2e   :  { %93 = vmax.xlane.f32.xlu0 %v92_v36 }
  0x9a   :  { %v65_v38 = vpop.xlane.xlu1 %64 }
  0x9b   :  { %v53_v40 = vpop.xlane.xlu0 %52  ;;  %v79_v53 = vmul.f32 0.00390625, %v65_v38 }
  0x9c   :  { %v75_v56 = vmul.f32 0.00390625, %v53_v40 }
  0x9d   :  { %v158_v63 = vrot.slane %v79_v53, %v132_v52 }
  0x9e   :  { %v68_v42 = vpop.xlane.xlu1 %67  ;;  %v133_v11 = vrot.slane %v75_v56, %v132_v52 }
  0x9f   :  { %v56_v45 = vpop.xlane.xlu0 %55  ;;  %v80_v47 = vmul.f32 0.00390625, %v68_v42 }
  0xa0   :  { %v76_v49 = vmul.f32 0.00390625, %v56_v45 }
  0xa1   :  { %v162_v58 = vrot.slane %v80_v47, %v137_v46 }
  0xa2   :  { %v71_v51 = vpop.xlane.xlu1 %70  ;;  %v138_v60 = vrot.slane %v76_v49, %v137_v46 }
  0xa3   :  { %v81_v54 = vmul.f32 0.00390625, %v71_v51  ;;  %v59_v55 = vpop.xlane.xlu0 %58  ;;  %v163_v17 = vsel %vm139_vm1, %v162_v58, %v158_v63  ;;  %v660_v63 = vld [vmem:[%s993_s1 + $0x28] sm:$0xff] }
  0xa4   :  { %v77_v57 = vmul.f32 0.00390625, %v59_v55  ;;  %v140_v23 = vsel %vm139_vm1, %v138_v60, %v133_v11 }
  0xa5   :  { %v167_v61 = vrot.slane %v81_v54, %v144_v50 }
  0xa6   :  { %v74_v62 = vpop.xlane.xlu1 %73  ;;  %v145_v3 = vrot.slane %v77_v57, %v144_v50 }
  0xa7   :  { %v82_v7 = vmul.f32 0.00390625, %v74_v62  ;;  %v62_v10 = vpop.xlane.xlu0 %61  ;;  %v168_v25 = vsel %vm146_vm2, %v167_v61, %v163_v17  ;;  %v662_v61 = vld [vmem:[%s993_s1 + $0x38] sm:$0xff]  ;;  %v661_v62 = vld [vmem:[%s993_s1 + $0x30] sm:$0xff] }
  0xa8   :  { %v78_v16 = vmul.f32 0.00390625, %v62_v10  ;;  %v147_v27 = vsel %vm146_vm2, %v145_v3, %v140_v23  ;;  %v659_v3 = vld [vmem:[%s993_s1 + $0x20] sm:$0xff] }
  0xa9   :  { %v172_v22 = vrot.slane %v82_v7, %v151_v59  ;;  %v664_v7 = vld [vmem:[%s995_s3 + $0x2] sm:$0x3] }
  0xaa   :  { %v152_v26 = vrot.slane %v78_v16, %v151_v59  ;;  %v88_v31 = vpop.xlane.xlu1 %87  ;;  %v666_v16 = vld [vmem:[%s994_s2 + $0x1] ss:$0 sm:$0xff] }
  0xab   :  { %v173_v28 = vsel %vm153_vm3, %v172_v22, %v168_v25  ;;  %v85_v32 = vpop.xlane.xlu0 %84  ;;  %v372_v33 = vrot.slane %v88_v31, %v137_v46 }
  0xac   :  { %v154_v29 = vsel %vm153_vm3, %v152_v26, %v147_v27  ;;  %v368_v34 = vrot.slane %v85_v32, %v132_v52 }
  0xad   :  { %v175_v30 = vsel %vm174_vm4, %v173_v28, %v154_v29  ;;  %v668_v28 = vld [vmem:[%s996_s4 + $0x1] ss:$0 sm:$0xff] }
  0xae   :  { %695 = vmatmul.mubr.msk.f32.vlgmr.msra.gmra.mxu0 %vm176_vm5, %v175_v30  ;;  %v373_v35 = vsel %vm139_vm1, %v372_v33, %v368_v34  ;;  %v100_v36 = vpop.xlane.xlu1 %99 }
  0xaf   :  { %715 = vmatprep.mubr.msk.f32.mxu0 %vm780_vm0, %v779_v24  ;;  %v97_v37 = vpop.xlane.xlu0 %96  ;;  %v391_v38 = vrot.slane %v100_v36, %v137_v46  ;;  %v112_v46 = vld [vmem:[%s995_s3] sm:$0x3]  ;;  %714 = vmatpush3.msk.msra.mxu0 %vm260_vm6, %v664_v7 }
  0xb0   :  { %v387_v39 = vrot.slane %v97_v37, %v132_v52  ;;  %698 = vmatpush3.msk.msra.mxu1 %vm260_vm6, %v112_v46 }
  0xb1   :  { %702 = vmatprep.subr.mxu1 %v779_v24 }
  0xb2   :  { %v392_v40 = vsel %vm139_vm1, %v391_v38, %v387_v39  ;;  %v103_v41 = vpop.xlane.xlu1 %102  ;;  %v568_v38 = vsub.s32 0, %v904_v44 }
  0xb3   :  { %v91_v42 = vpop.xlane.xlu0 %90  ;;  %v396_v43 = vrot.slane %v103_v41, %v144_v50 }
  0xb4   :  { %v377_v45 = vrot.slane %v91_v42, %v144_v50  ;;  %v653_v50 = vld [vmem:[%s994_s2] ss:$0 sm:$0xff]  ;;  %v587_v42 = vsub.s32 1, %v904_v44  ;;  %s781_s2 = smov [#allocation5]  }
  0xb5   :  { %v397_v47 = vsel %vm146_vm2, %v396_v43, %v392_v40 }
  0xb6   :  { %v378_v48 = vsel %vm146_vm2, %v377_v45, %v373_v35  ;;  %v106_v49 = vpop.xlane.xlu1 %105 }
  0xb7   :  { %v94_v51 = vpop.xlane.xlu0 %93  ;;  %v401_v53 = vrot.slane %v106_v49, %v151_v59 }
  0xb8   :  { %v382_v54 = vrot.slane %v94_v51, %v151_v59 }
  0xb9   :  { %v402_v55 = vsel %vm153_vm3, %v401_v53, %v397_v47 }
  0xba   :  { %v383_v56 = vsel %vm153_vm3, %v382_v54, %v378_v48 }
  0xbb   :  { %v403_v52 = vsel %vm174_vm4, %v402_v55, %v383_v56 }
 0x16e   :  { %v245_v57 = vpop.f32.mrf.mxu0 }
 0x16f   :  { %v246_v58 = vadd.f32 %v653_v50, %v245_v57 }
 0x170   :  { %v696_v59 = vpop.f32.mrf.mxu0 }
 0x171   :  { %v249_v60 = vmax.f32 %v246_v58, 0.0 }
 0x173   :  { %700 = vmatmul.mubr.msk.f32.vlgmr.msra.gmra.mxu1 %vm256_vm7, %v249_v60 }
 0x174   :  { %703 = vmatpush3.msra.mxu1 %v662_v61  ;;  %710 = vmatprep.mubr.msk.f32.mxu1 %vm780_vm0, %v779_v24 }
 0x175   :  { %704 = vmatprep.subr.mxu1 %v779_v24 }
 0x176   :  { %705 = vmatpush3.msra.mxu1 %v661_v62 }
 0x177   :  { %706 = vmatprep.subr.mxu1 %v779_v24 }
 0x178   :  { %707 = vmatpush3.msra.mxu1 %v660_v63 }
 0x179   :  { %708 = vmatprep.subr.mxu1 %v779_v24  ;;  %v655_v24 = vld [vmem:[%s996_s4] ss:$0 sm:$0xff]  ;;  %s641_s4 = sshll.u32 %s781_s2, 4  ;;  %s642_s4 = int_to_ptr.vmem [resolvable:$true] %s641_s4 }
 0x17a   :  { %709 = vmatpush3.msra.mxu1 %v659_v3  ;;  %s752_s26 = scalar_lea.vmem %s642_s4, 2048  ;;  %p757_p6 = scmp.lt.s32.totalorder %s642_s4, %s642_s4 }
 0x17b   :  { %711 = vmatmul.mubr.msk.f32.vlgmr.msra.gmra.mxu1 %vm176_vm5, %v403_v52  ;;  %p753_p5 = scmp.ne.s32.totalorder %s642_s4, %s752_s26  ;;  %p758_p7 = scmp.lt.s32.totalorder %s752_s26, %s752_s26 }
 0x17d   :  { %p759_p8 = por %p758_p7, %p757_p6 }
 0x17f   :  { %p760_p9 = pnand %p759_p8, %p753_p5 }
 0x233   :  { %v330_v10 = vpop.f32.mrf.mxu1 }
 0x234   :  { %v331_v26 = vadd.f32 %v655_v24, %v330_v10 }
 0x235   :  { %v701_v11 = vpop.f32.mrf.mxu1 }
 0x236   :  { %v658_v27 = vmul.f32 -1.442695, %v331_v26 }
 0x238   :  { %724 = vpow2.f32 %v658_v27 }
 0x23b   :  { %v472_v17 = vpop.f32.mrf.mxu1 }
 0x23c   :  { %v473_v22 = vadd.f32 %v666_v16, %v472_v17 }
 0x23d   :  { %v712_v23 = vpop.f32.mrf.mxu1 }
 0x23e   :  { %v476_v25 = vmax.f32 %v473_v22, 0.0 }
 0x240   :  { %716 = vmatmul.mubr.msk.f32.vlgmr.msra.gmra.mxu0 %vm256_vm7, %v476_v25 }
 0x245   :  { %v725_v33 = vpop.eup %724 }
 0x246   :  { %v337_v34 = vadd.f32 1.0, %v725_v33 }
 0x300   :  { %v555_v29 = vpop.f32.mrf.mxu0 }
 0x301   :  { %v556_v30 = vadd.f32 %v668_v28, %v555_v29 }
 0x302   :  { %v717_v31 = vpop.f32.mrf.mxu0 }
 0x303   :  { %v671_v32 = vmul.f32 -1.442695, %v556_v30 }
 0x305   :  { %726 = vpow2.f32 %v671_v32 }
 0x306   :  { %728 = vrcp.f32 %v337_v34 }
 0x312   :  { %v727_v35 = vpop.eup %726 }
 0x313   :  { %v562_v36 = vadd.f32 1.0, %v727_v35  ;;  %v729_v37 = vpop.eup %728 }
 0x315   :  { %730 = vrcp.f32 %v562_v36 }
 0x322   :  { %v731_v39 = vpop.eup %730 }
 0x323   :  { %v565_v40 = vadd.f32 %v731_v39, %v729_v37 }
 0x325   :  { %v569_v41 = vrot.slane %v565_v40, %v568_v38  ;;  %v588_v43 = vrot.slane %v565_v40, %v587_v42 }
 0x327   :  { %575 = vbcast.lane.b32.xlu1 %v569_v41, 264  ;;  %571 = vbcast.lane.b32.xlu0 %v569_v41, 256 }
 0x32b   :  { %579 = vbcast.lane.b32.xlu1 %v569_v41, 272  ;;  %590 = vbcast.lane.b32.xlu0 %v588_v43, 256 }
 0x32f   :  { %583 = vbcast.lane.b32.xlu1 %v569_v41, 280  ;;  %598 = vbcast.lane.b32.xlu0 %v588_v43, 272 }
 0x333   :  { %594 = vbcast.lane.b32.xlu1 %v588_v43, 264 }
 0x337   :  { %602 = vbcast.lane.b32.xlu1 %v588_v43, 280 }
 0x399   :  { %v576_v45 = vpop.permute.xlu1 %575  ;;  %v572_v47 = vpop.permute.xlu0 %571 }
 0x39a   :  { %v606_v48 = vmul.f32 %v576_v45, %v834_v8  ;;  %v607_v49 = vmul.f32 %v576_v45, %v836_v9  ;;  %v604_v51 = vmul.f32 %v572_v47, %v822_v2  ;;  %v605_v53 = vmul.f32 %v572_v47, %v826_v4 }
 0x39c   :  { %622 = vst [vmem:[#allocation5 + $0x10] sm:$0xff] %v606_v48  ;;  %623 = vst [vmem:[#allocation5 + $0x18] sm:$0xff] %v607_v49 }
 0x39d   :  { %620 = vst [vmem:[#allocation5] sm:$0xff] %v604_v51  ;;  %621 = vst [vmem:[#allocation5 + $0x8] sm:$0xff] %v605_v53  ;;  %v580_v44 = vpop.permute.xlu1 %579  ;;  %v591_v54 = vpop.permute.xlu0 %590 }
 0x39e   :  { %v608_v55 = vmul.f32 %v580_v44, %v846_v14  ;;  %v609_v56 = vmul.f32 %v580_v44, %v848_v15  ;;  %v612_v46 = vmul.f32 %v591_v54, %v818_v0  ;;  %v613_v8 = vmul.f32 %v591_v54, %v820_v1 }
 0x3a0   :  { %624 = vst [vmem:[#allocation5 + $0x20] sm:$0xff] %v608_v55  ;;  %625 = vst [vmem:[#allocation5 + $0x28] sm:$0xff] %v609_v56 }
 0x3a1   :  { %628 = vst [vmem:[#allocation5 + $0x40] sm:$0xff] %v612_v46  ;;  %629 = vst [vmem:[#allocation5 + $0x48] sm:$0xff] %v613_v8  ;;  %v584_v2 = vpop.permute.xlu1 %583  ;;  %v599_v4 = vpop.permute.xlu0 %598 }
 0x3a2   :  { %v610_v9 = vmul.f32 %v584_v2, %v858_v20  ;;  %v611_v52 = vmul.f32 %v584_v2, %v860_v21  ;;  %v616_v50 = vmul.f32 %v599_v4, %v842_v12  ;;  %v617_v14 = vmul.f32 %v599_v4, %v844_v13 }
 0x3a4   :  { %626 = vst [vmem:[#allocation5 + $0x30] sm:$0xff] %v610_v9  ;;  %627 = vst [vmem:[#allocation5 + $0x38] sm:$0xff] %v611_v52 }
 0x3a5   :  { %632 = vst [vmem:[#allocation5 + $0x60] sm:$0xff] %v616_v50  ;;  %633 = vst [vmem:[#allocation5 + $0x68] sm:$0xff] %v617_v14  ;;  %v595_v0 = vpop.permute.xlu1 %594 }
 0x3a6   :  { %v614_v1 = vmul.f32 %v595_v0, %v828_v5  ;;  %v615_v15 = vmul.f32 %v595_v0, %v830_v6 }
 0x3a8   :  { %630 = vst [vmem:[#allocation5 + $0x50] sm:$0xff] %v614_v1  ;;  %631 = vst [vmem:[#allocation5 + $0x58] sm:$0xff] %v615_v15 }
 0x3a9   :  { %v603_v20 = vpop.permute.xlu1 %602 }
 0x3aa   :  { %v618_v21 = vmul.f32 %v603_v20, %v854_v18  ;;  %v619_v12 = vmul.f32 %v603_v20, %v856_v19 }
 0x3ac   :  { %634 = vst [vmem:[#allocation5 + $0x70] sm:$0xff] %v618_v21  ;;  %635 = vst [vmem:[#allocation5 + $0x78] sm:$0xff] %v619_v12 }
 0x3ad   :  { %763 = shalt.err (!%p760_p9)
}
 0x3ae   :  { %647 = dma.vmem_to_hbm [thread:$0]  %s642_s4, 2048, %s997_s5, [#allocation4], %s777_s21, %s777_s21, %s778_s22  }
 0x3af   :  { %774 = dma.done.wait [#allocation4], 2048  }
 0x3b0   :  { %775 = vsyncadd [#allocation4], 4294965248 }
 0x3b1   :  { %651 = vsyncpa [#allocation3], 1 }
 0x3b2   :  { %652 = vsyncpa [#allocation4], 1 }

</bundles_post_ra>
